<compile_context>
chip_gen: v7x
topology: tpu7x:2x2x1
jax: 0.10.0
libtpu: 0.0.40
codegen_flags: <defaults>
</compile_context>

<pallas_src>
import functools

import jax
import jax.numpy as jnp
from jax import lax
from jax.experimental import pallas as pl
from jax.experimental.pallas import tpu as pltpu

_LANE_CANDIDATES = (512, 256, 128)  # widest lane (multiple of 128) dividing n
_ACC_ROWS = 256                     # accumulator rows (decoupled from block rows)
_NUM_CHUNKS = 2                     # "parallel" leading axis -> megacore on v7x
_MIB = 1024 * 1024


def _round_up(x, m):
    return ((x + m - 1) // m) * m


@functools.lru_cache(maxsize=None)
def _chip_config():
    """Returns (per-input block bytes, explicit VMEM limit) per TPU generation."""
    try:
        kind = jax.devices()[0].device_kind.lower()
    except Exception:  # pragma: no cover - defensive; default config below
        kind = ""
    if "v5 lite" in kind or "v5e" in kind or "v5lite" in kind:
        # v5e: 2 MiB blocks -> 3 inputs x 2 bufs x 2 MiB + 0.5 MiB acc ~= 12.5 MiB.
        return 2 * _MIB, 15 * _MIB
    # v6e / v7x (and default): 4 MiB blocks -> 3 x 2 x 4 MiB + 0.5 MiB acc
    # ~= 24.5 MiB: under the 32 MiB scoped default and leaves headroom under
    # v7x's 64 MiB physical VMEM for Mosaic internal scratch.
    return 4 * _MIB, 30 * _MIB


def _make_kernel(rows, br, acc_rows, lane):
    """Builds the accumulate kernel for a (rows, lane) view tiled in (br, lane)."""
    n_strips = br // acc_rows

    def kernel(content_ref, xgen_ref, heat_ref, loss_ref, acc_ref):
        c_idx = pl.program_id(0)
        j = pl.program_id(1)
        steps = pl.num_programs(1)
        bi = c_idx * steps + j          # logical (unclamped) block index
        row0 = bi * br                  # first global row this step would cover

        @pl.when(j == 0)
        def _():
            acc_ref[...] = jnp.zeros_like(acc_ref)

        def strip_d2(s):
            r0 = s * acc_rows           # static slice -> zero runtime cost
            cv = content_ref[r0:r0 + acc_rows, :].astype(jnp.float32)
            xv = xgen_ref[r0:r0 + acc_rows, :].astype(jnp.float32)
            hv = heat_ref[r0:r0 + acc_rows, :].astype(jnp.float32)
            d = hv * (cv - xv)          # == c*h - x*h, one fewer vmul per vreg
            return d * d

        # Hot path: block fully in range -> no masking work (keeps VPU hidden
        # under DMA even with bf16 inputs).
        @pl.when(row0 + br <= rows)
        def _():
            for s in range(n_strips):
                acc_ref[...] += strip_d2(s)

        # Boundary / dead block: the tail of the VMEM buffer holds undefined
        # data, so mask with a select (NOT a 0/1 multiply) before accumulating.
        @pl.when(row0 + br > rows)
        def _():
            iota = lax.broadcasted_iota(jnp.int32, (acc_rows, lane), 0)
            for s in range(n_strips):
                limit = rows - row0 - s * acc_rows   # scalar; may be <= 0
                acc_ref[...] += jnp.where(iota < limit, strip_d2(s), 0.0)

        @pl.when(j == steps - 1)
        def _():
            # One cheap cross-lane reduce per chunk (acc is only acc_rows*lane).
            loss_ref[0, 0] = jnp.sum(acc_ref[...])

    return kernel


def _mse_heatmap_loss(content, xgen, heat):
    n = content.size
    cf = content.reshape(-1)
    xf = xgen.reshape(-1)
    hf = heat.reshape(-1)

    block_bytes, vmem_limit = _chip_config()

    # Widest lane (multiple of 128) dividing n -> the 1D->2D reshape below is a
    # free metadata op: no jnp.pad, no extra HBM traffic at all.
    lane = next((c for c in _LANE_CANDIDATES if n % c == 0), 0)
    if lane:
        n_main = n
    else:
        # Ragged case: kernel covers the lane-aligned prefix; the < 128-element
        # remainder is summed with plain jnp (review option (b)).
        lane = 128
        n_main = (n // lane) * lane

    tail_sum = jnp.float32(0.0)
    if n_main < n:
        dt = (hf[n_main:] * (cf[n_main:] - xf[n_main:])).astype(jnp.float32)
        tail_sum = jnp.sum(dt * dt)
    if n_main == 0:
        return tail_sum / jnp.float32(n)

    rows = n_main // lane
    if n_main < n:
        cf, xf, hf = cf[:n_main], xf[:n_main], hf[:n_main]
    cm = cf.reshape(rows, lane)
    xm = xf.reshape(rows, lane)
    hm = hf.reshape(rows, lane)

    # Sublane granularity: 8 for 32-bit, 16 for bf16, 32 for 8-bit inputs.
    min_sub = max(32 // jnp.dtype(a.dtype).itemsize for a in (cm, xm, hm))

    block_rows = max(min_sub, block_bytes // (lane * 4))
    br = min(block_rows, _round_up(rows, min_sub))
    acc_rows = min(_ACC_ROWS, br)
    br = _round_up(br, acc_rows)

    total_blocks = pl.cdiv(rows, br)
    chunks = _NUM_CHUNKS if total_blocks >= _NUM_CHUNKS else 1
    steps = pl.cdiv(total_blocks, chunks)
    last_block = total_blocks - 1

    # Grid sized from the true row count; at most (chunks-1) trailing steps are
    # dead.  Clamp their block index so they re-read the last valid block
    # (no OOB DMA); in-kernel masking zeroes their contribution.
    in_spec = pl.BlockSpec(
        (br, lane), lambda c, j: (jnp.minimum(c * steps + j, last_block), 0))

    bytes_per_elem = sum(jnp.dtype(a.dtype).itemsize for a in (cm, xm, hm))

    partial_sums = pl.pallas_call(
        _make_kernel(rows=rows, br=br, acc_rows=acc_rows, lane=lane),
        out_shape=jax.ShapeDtypeStruct((chunks, 1), jnp.float32),
        grid_spec=pltpu.PrefetchScalarGridSpec(
            num_scalar_prefetch=0,
            grid=(chunks, steps),
            in_specs=[in_spec, in_spec, in_spec],      # content, x_gen, heatmap
            out_specs=pl.BlockSpec((1, 1), lambda c, j: (c, 0),
                                   memory_space=pltpu.SMEM),
            scratch_shapes=[pltpu.VMEM((acc_rows, lane), jnp.float32)],
        ),
        compiler_params=pltpu.CompilerParams(
            dimension_semantics=("parallel", "arbitrary"),
            vmem_limit_bytes=vmem_limit),
        cost_estimate=pl.CostEstimate(
            flops=5 * n_main, transcendentals=0,
            bytes_accessed=n_main * bytes_per_elem),
    )(cm, xm, hm)

    return (jnp.sum(partial_sums) + tail_sum) / jnp.float32(n)


mse_heatmap_loss = jax.jit(_mse_heatmap_loss)


class DistanceTransform:
    """JAX/Pallas port of the PyTorch DistanceTransform module."""

    def __init__(self, x_content, heatmap):
        # detach() has no analog needed in JAX; arrays are already values.
        # For a pure HBM-bound kernel, storing x_content/heatmap as bf16 here
        # would halve DMA traffic (kernel upcasts to f32); kept f32 for parity.
        self.x_content = x_content
        self.heatmap = heatmap
        # content*heatmap is fused inside the kernel (free under the HBM
        # bottleneck), so no precompute pass is needed at init.
        self.loss = None

    def forward(self, x_gen):
        self.loss = mse_heatmap_loss(self.x_content, x_gen, self.heatmap)
        return x_gen  # pass-through, exactly like the PyTorch module


if __name__ == "__main__":
    B, C, H, W = 2, 4, 16, 16
    key = jax.random.PRNGKey(0)
    k1, k2, k3 = jax.random.split(key, 3)

    x_content = jax.random.normal(k1, (B, C, H, W), dtype=jnp.float32)
    heatmap = jax.random.uniform(k2, (B, C, H, W), dtype=jnp.float32)
    x_gen = jax.random.normal(k3, (B, C, H, W), dtype=jnp.float32)

    module = DistanceTransform(x_content, heatmap)
    out = jax.block_until_ready(module.forward(x_gen))
    loss = jax.block_until_ready(module.loss)

    ref_loss = jnp.mean((x_content * heatmap - x_gen * heatmap) ** 2)
    assert jnp.allclose(out, x_gen), "forward must return x_gen unchanged"
    assert jnp.allclose(loss, ref_loss, rtol=1e-5, atol=1e-6), (
        float(loss), float(ref_loss))

    # Ragged shape (n not a multiple of 128): exercises the no-pad prefix+tail path.
    shp = (2, 3, 5, 7)
    xc2 = jax.random.normal(k1, shp, dtype=jnp.float32)
    hm2 = jax.random.uniform(k2, shp, dtype=jnp.float32)
    xg2 = jax.random.normal(k3, shp, dtype=jnp.float32)
    loss2 = jax.block_until_ready(mse_heatmap_loss(xc2, xg2, hm2))
    ref2 = jnp.mean((xc2 * hm2 - xg2 * hm2) ** 2)
    assert jnp.allclose(loss2, ref2, rtol=1e-5, atol=1e-6), (
        float(loss2), float(ref2))

    print("KERNEL_OK")
</pallas_src>

<mosaic_0001>
module attributes {stable_mosaic.version = 11 : i64} {
  func.func @kernel(%arg0: i32, %arg1: i32, %arg2: memref<8x512xf32, #tpu.memory_space<vmem>>, %arg3: memref<8x512xf32, #tpu.memory_space<vmem>>, %arg4: memref<8x512xf32, #tpu.memory_space<vmem>>, %arg5: memref<1x1xf32, #tpu.memory_space<smem>>, %arg6: memref<8x512xf32, #tpu.memory_space<vmem>>) attributes {dimension_semantics = [#tpu.dimension_semantics<parallel>, #tpu.dimension_semantics<arbitrary>], iteration_bounds = array<i64: 1, 1>, scalar_prefetch = 0 : i64, scratch_operands = 1 : i64, tpu.core_type = #tpu.core_type<tc>, window_params = [{transform_indices = @transform_0, window_bounds = array<i64: 8, 512>}, {transform_indices = @transform_1, window_bounds = array<i64: 8, 512>}, {transform_indices = @transform_2, window_bounds = array<i64: 8, 512>}, {transform_indices = @transform_3, window_bounds = array<i64: 1, 1>}]} {
    %c1_i32 = arith.constant 1 : i32
    %0 = arith.muli %arg0, %c1_i32 : i32
    %1 = arith.addi %0, %arg1 : i32
    %c8_i32 = arith.constant 8 : i32
    %2 = arith.muli %1, %c8_i32 : i32
    %c0_i32 = arith.constant 0 : i32
    %3 = arith.cmpi eq, %arg1, %c0_i32 : i32
    %4 = arith.extui %3 : i1 to i32
    %c0_i32_0 = arith.constant 0 : i32
    %5 = arith.cmpi ne, %4, %c0_i32_0 : i32
    scf.if %5 {
      %cst = arith.constant 0.000000e+00 : f32
      %17 = vector.broadcast %cst : f32 to vector<8x512xf32>
      %c0 = arith.constant 0 : index
      %c0_8 = arith.constant 0 : index
      %18 = vector.load %arg6[%c0, %c0_8] : memref<8x512xf32, #tpu.memory_space<vmem>>, vector<8x512xf32>
      tpu.vector_store %arg6[%c0, %c0_8], %17 {strides = array<i32>} : memref<8x512xf32, #tpu.memory_space<vmem>>, vector<8x512xf32>,
    } else {
    }
    %c8_i32_1 = arith.constant 8 : i32
    %6 = arith.addi %2, %c8_i32_1 : i32
    %c4_i32 = arith.constant 4 : i32
    %7 = arith.cmpi sle, %6, %c4_i32 : i32
    %8 = arith.extui %7 : i1 to i32
    %c0_i32_2 = arith.constant 0 : i32
    %9 = arith.cmpi ne, %8, %c0_i32_2 : i32
    scf.if %9 {
      %c0 = arith.constant 0 : index
      %c0_8 = arith.constant 0 : index
      %17 = vector.load %arg6[%c0, %c0_8] : memref<8x512xf32, #tpu.memory_space<vmem>>, vector<8x512xf32>
      %c0_9 = arith.constant 0 : index
      %c0_10 = arith.constant 0 : index
      %18 = vector.load %arg2[%c0_9, %c0_10] : memref<8x512xf32, #tpu.memory_space<vmem>>, vector<8x512xf32>
      %c0_11 = arith.constant 0 : index
      %c0_12 = arith.constant 0 : index
      %19 = vector.load %arg3[%c0_11, %c0_12] : memref<8x512xf32, #tpu.memory_space<vmem>>, vector<8x512xf32>
      %c0_13 = arith.constant 0 : index
      %c0_14 = arith.constant 0 : index
      %20 = vector.load %arg4[%c0_13, %c0_14] : memref<8x512xf32, #tpu.memory_space<vmem>>, vector<8x512xf32>
      %21 = arith.subf %18, %19 : vector<8x512xf32>
      %22 = arith.mulf %20, %21 : vector<8x512xf32>
      %23 = arith.mulf %22, %22 : vector<8x512xf32>
      %24 = arith.addf %17, %23 : vector<8x512xf32>
      %c0_15 = arith.constant 0 : index
      %c0_16 = arith.constant 0 : index
      %25 = vector.load %arg6[%c0_15, %c0_16] : memref<8x512xf32, #tpu.memory_space<vmem>>, vector<8x512xf32>
      tpu.vector_store %arg6[%c0_15, %c0_16], %24 {strides = array<i32>} : memref<8x512xf32, #tpu.memory_space<vmem>>, vector<8x512xf32>,
    } else {
    }
    %c8_i32_3 = arith.constant 8 : i32
    %10 = arith.addi %2, %c8_i32_3 : i32
    %c4_i32_4 = arith.constant 4 : i32
    %11 = arith.cmpi sgt, %10, %c4_i32_4 : i32
    %12 = arith.extui %11 : i1 to i32
    %c0_i32_5 = arith.constant 0 : i32
    %13 = arith.cmpi ne, %12, %c0_i32_5 : i32
    scf.if %13 {
      %17 = tpu.iota {dimensions = array<i32: 0>} : vector<8x512xi32>
      %c4_i32_8 = arith.constant 4 : i32
      %18 = arith.subi %c4_i32_8, %2 : i32
      %c0_i32_9 = arith.constant 0 : i32
      %19 = arith.subi %18, %c0_i32_9 : i32
      %c0 = arith.constant 0 : index
      %c0_10 = arith.constant 0 : index
      %20 = vector.load %arg6[%c0, %c0_10] : memref<8x512xf32, #tpu.memory_space<vmem>>, vector<8x512xf32>
      %21 = vector.broadcast %19 : i32 to vector<8x512xi32>
      %22 = arith.cmpi slt, %17, %21 : vector<8x512xi32>
      %c0_11 = arith.constant 0 : index
      %c0_12 = arith.constant 0 : index
      %23 = vector.load %arg2[%c0_11, %c0_12] : memref<8x512xf32, #tpu.memory_space<vmem>>, vector<8x512xf32>
      %c0_13 = arith.constant 0 : index
      %c0_14 = arith.constant 0 : index
      %24 = vector.load %arg3[%c0_13, %c0_14] : memref<8x512xf32, #tpu.memory_space<vmem>>, vector<8x512xf32>
      %c0_15 = arith.constant 0 : index
      %c0_16 = arith.constant 0 : index
      %25 = vector.load %arg4[%c0_15, %c0_16] : memref<8x512xf32, #tpu.memory_space<vmem>>, vector<8x512xf32>
      %26 = arith.subf %23, %24 : vector<8x512xf32>
      %27 = arith.mulf %25, %26 : vector<8x512xf32>
      %28 = arith.mulf %27, %27 : vector<8x512xf32>
      %cst = arith.constant 0.000000e+00 : f32
      %29 = vector.broadcast %cst : f32 to vector<8x512xf32>
      %30 = arith.select %22, %28, %29 : vector<8x512xi1>, vector<8x512xf32>
      %31 = arith.addf %20, %30 : vector<8x512xf32>
      %c0_17 = arith.constant 0 : index
      %c0_18 = arith.constant 0 : index
      %32 = vector.load %arg6[%c0_17, %c0_18] : memref<8x512xf32, #tpu.memory_space<vmem>>, vector<8x512xf32>
      tpu.vector_store %arg6[%c0_17, %c0_18], %31 {strides = array<i32>} : memref<8x512xf32, #tpu.memory_space<vmem>>, vector<8x512xf32>,
    } else {
    }
    %c0_i32_6 = arith.constant 0 : i32
    %14 = arith.cmpi eq, %arg1, %c0_i32_6 : i32
    %15 = arith.extui %14 : i1 to i32
    %c0_i32_7 = arith.constant 0 : i32
    %16 = arith.cmpi ne, %15, %c0_i32_7 : i32
    scf.if %16 {
      %c0 = arith.constant 0 : index
      %c0_8 = arith.constant 0 : index
      %17 = vector.load %arg6[%c0, %c0_8] : memref<8x512xf32, #tpu.memory_space<vmem>>, vector<8x512xf32>
      %18 = vector.shape_cast %17 : vector<8x512xf32> to vector<1x8x512xf32>
      %cst = arith.constant dense<0.000000e+00> : vector<1xf32>
      %19 = vector.multi_reduction <add>, %18, %cst [1, 2] : vector<1x8x512xf32> to vector<1xf32>
      %20 = vector.shape_cast %19 : vector<1xf32> to vector<1x1x1xf32>
      %21 = vector.extract %20[0, 0, 0] : f32 from vector<1x1x1xf32>
      %c0_9 = arith.constant 0 : index
      %c0_10 = arith.constant 0 : index
      %22 = memref.load %arg5[%c0_9, %c0_10] : memref<1x1xf32, #tpu.memory_space<smem>>
      memref.store %21, %arg5[%c0_9, %c0_10] : memref<1x1xf32, #tpu.memory_space<smem>>
    } else {
    }
    return
  }
  func.func @transform_0(%arg0: i32, %arg1: i32) -> (i32, i32) {
    %c1_i32 = arith.constant 1 : i32
    %0 = arith.muli %arg0, %c1_i32 : i32
    %1 = arith.addi %0, %arg1 : i32
    %c0_i32 = arith.constant 0 : i32
    %2 = arith.minsi %1, %c0_i32 : i32
    %c0_i32_0 = arith.constant 0 : i32
    %c0_i32_1 = arith.constant 0 : i32
    return %2, %c0_i32_0 : i32, i32
  }
  func.func @transform_1(%arg0: i32, %arg1: i32) -> (i32, i32) {
    %c1_i32 = arith.constant 1 : i32
    %0 = arith.muli %arg0, %c1_i32 : i32
    %1 = arith.addi %0, %arg1 : i32
    %c0_i32 = arith.constant 0 : i32
    %2 = arith.minsi %1, %c0_i32 : i32
    %c0_i32_0 = arith.constant 0 : i32
    %c0_i32_1 = arith.constant 0 : i32
    return %2, %c0_i32_0 : i32, i32
  }
  func.func @transform_2(%arg0: i32, %arg1: i32) -> (i32, i32) {
    %c1_i32 = arith.constant 1 : i32
    %0 = arith.muli %arg0, %c1_i32 : i32
    %1 = arith.addi %0, %arg1 : i32
    %c0_i32 = arith.constant 0 : i32
    %2 = arith.minsi %1, %c0_i32 : i32
    %c0_i32_0 = arith.constant 0 : i32
    %c0_i32_1 = arith.constant 0 : i32
    return %2, %c0_i32_0 : i32, i32
  }
  func.func @transform_3(%arg0: i32, %arg1: i32) -> (i32, i32) {
    %c0_i32 = arith.constant 0 : i32
    %c0_i32_0 = arith.constant 0 : i32
    return %arg0, %c0_i32 : i32, i32
  }
}

</mosaic_0001>

<bundles_post_ra>
// kernel: _mse_heatmap_loss.1
= control target key start
LH: loop header
LB: loop body
LE: loop exit
PB: predicated region body
PF: predicated region fallthrough
CT: control target
= control target key end

     0   :  { %v232_v0 = vlaneseq  ;;  %s425_s0 = inlined_call_operand.vmem [shape: f32[4,512], index: 0, kind: input, shape index: {}]   ;;  %s426_s1 = inlined_call_operand.vmem [shape: f32[4,512], index: 1, kind: input, shape index: {}]   ;;  %s427_s2 = inlined_call_operand.vmem [shape: f32[4,512], index: 2, kind: input, shape index: {}]   ;;  %s428_s3 = inlined_call_operand.hbm [shape: f32[1,1], index: 3, kind: output, shape index: {}]  }
   0x1   :  { %v241_v1 = vld [vmem:[%s425_s0] sm:$0xff]  ;;  %v242_v2 = vld [vmem:[%s425_s0 + $0x8] sm:$0xff]  ;;  %v243_v3 = vld [vmem:[%s425_s0 + $0x10] sm:$0xff] }
   0x2   :  { %v244_v4 = vld [vmem:[%s425_s0 + $0x18] sm:$0xff]  ;;  %v245_v5 = vld [vmem:[%s426_s1] sm:$0xff]  ;;  %v246_v6 = vld [vmem:[%s426_s1 + $0x8] sm:$0xff]  ;;  %v233_v17 = vshrl.u32 %v232_v0, 7 }
   0x3   :  { %v247_v7 = vld [vmem:[%s426_s1 + $0x10] sm:$0xff]  ;;  %v248_v8 = vld [vmem:[%s426_s1 + $0x18] sm:$0xff]  ;;  %v249_v9 = vld [vmem:[%s427_s2] sm:$0xff]  ;;  %v253_v10 = vsub.f32 %v241_v1, %v245_v5  ;;  %v254_v11 = vsub.f32 %v242_v2, %v246_v6 }
   0x4   :  { %v250_v12 = vld [vmem:[%s427_s2 + $0x8] sm:$0xff]  ;;  %v251_v13 = vld [vmem:[%s427_s2 + $0x10] sm:$0xff]  ;;  %v252_v14 = vld [vmem:[%s427_s2 + $0x18] sm:$0xff]  ;;  %v255_v15 = vsub.f32 %v243_v3, %v247_v7  ;;  %v256_v16 = vsub.f32 %v244_v4, %v248_v8 }
   0x5   :  { %v257_v18 = vmul.f32 %v253_v10, %v249_v9  ;;  %v258_v19 = vmul.f32 %v254_v11, %v250_v12 }
   0x6   :  { %8 = vsyncpa [#allocation4], 0  ;;  %v259_v20 = vmul.f32 %v255_v15, %v251_v13  ;;  %v260_v21 = vmul.f32 %v256_v16, %v252_v14  ;;  %vm240_vm0 = vcmp.lt.s32.totalorder %v233_v17, 4  ;;  %s344_s9 = scalar_lea.hbm %s428_s3, 16 }
   0x7   :  { %v261_v22 = vmul.f32 %v257_v18, %v257_v18  ;;  %v262_v23 = vmul.f32 %v258_v19, %v258_v19  ;;  %p345_p0 = scmp.ne.s32.totalorder %s428_s3, %s344_s9  ;;  %p348_p1 = scmp.lt.u32.totalorder %s344_s9, %s428_s3 }
   0x8   :  { %v263_v24 = vmul.f32 %v259_v20, %v259_v20  ;;  %v264_v25 = vmul.f32 %v260_v21, %v260_v21 }
   0x9   :  { %p350_p2 = pnand %p348_p1, %p345_p0 }
   0xa   :  { %v269_v26 = vcombine.low %v261_v22, %v263_v24  ;;  %v270_v27 = vcombine.high %v261_v22, %v263_v24  ;;  %v271_v28 = vcombine.low %v262_v23, %v264_v25  ;;  %v272_v29 = vcombine.high %v262_v23, %v264_v25 }
   0xc   :  { %v277_v30 = vsel %vm240_vm0, %v269_v26, 0.0  ;;  %v278_v31 = vsel %vm240_vm0, %v270_v27, 0.0  ;;  %v279_v32 = vsel %vm240_vm0, %v271_v28, 0.0  ;;  %v280_v34 = vsel %vm240_vm0, %v272_v29, 0.0 }
   0xd   :  { %v296_v33 = vadd.f32 %v278_v31, %v277_v30 }
   0xf   :  { %v297_v35 = vadd.f32 %v296_v33, %v279_v32 }
  0x11   :  { %v298_v36 = vadd.f32 %v297_v35, %v280_v34 }
  0x13   :  { %299 = vadd.xlane.f32.xlu0 %v298_v36 }
  0xa0   :  { %v300_v37 = vpop.xlane.xlu0 %299 }
  0xa1   :  { %v301_v38 = vrot.slane %v300_v37, 4 }
  0xa3   :  { %v302_v39 = vadd.f32 %v301_v38, %v300_v37 }
  0xa5   :  { %v303_v40 = vrot.slane %v302_v39, 2 }
  0xa7   :  { %v304_v41 = vadd.f32 %v303_v40, %v302_v39 }
  0xa9   :  { %v305_v42 = vrot.slane %v304_v41, 1 }
  0xab   :  { %v306_v43 = vadd.f32 %v305_v42, %v304_v41 }
  0xad   :  { %341 = vpush %v306_v43 }
  0xde   :  { %s342_s1 = spop %341 }
  0xdf   :  { %309 = sst [smem:[#allocation3]] %s342_s1 }
  0xe0   :  { %353 = shalt.err (!%p350_p2)
}
  0xe1   :  { %s356_s14 = smov [#allocation3]  }
  0xe2   :  { %317 = dma.smem_to_hbm %s356_s14, 16, %s428_s3, [#allocation4]  }
  0xe3   :  { %354 = dma.done.wait [#allocation4], 16  }
  0xe4   :  { %355 = vsyncadd [#allocation4], 4294967280 }
  0xe5   :  { %321 = sfence }
  0xe6   :  { %322 = vsyncpa [#allocation4], 1 }

</bundles_post_ra>
